<compile_context>
chip_gen: v7x
topology: tpu7x:2x2x1
jax: 0.10.0
libtpu: 0.0.40
codegen_flags: <defaults>
</compile_context>

<pallas_src>
import functools

import jax
import jax.numpy as jnp
from jax import lax
from jax.experimental import pallas as pl
from jax.experimental.pallas import tpu as pltpu


def _round_up(x, m):
    return (x + m - 1) // m * m


def _gene_encoder_kernel(ids_ref, emb_hbm, gamma_ref, beta_ref, out_ref,
                         rows_vmem, sem, *, block_tokens, chunk_tokens, eps):
    """One grid step = LayerNorm(embedding rows) for `block_tokens` tokens.

    ids_ref   : (N_pad,)               int32   SMEM (scalar prefetch)
    emb_hbm   : (V, D)                 native  HBM (pl.ANY), DMA'd row by row
    gamma_ref : (1, D)                 f32     VMEM (grid-resident)
    beta_ref  : (1, D)                 f32     VMEM (grid-resident)
    out_ref   : (block_tokens, D)      VMEM tile of the (N_pad, D) output
    rows_vmem : (2, chunk_tokens, D)   native-dtype double-buffered gather buf
    sem       : (2,) DMA semaphores    one accumulating semaphore per slot
    """
    tile = pl.program_id(0)
    base = tile * block_tokens
    n_chunks = block_tokens // chunk_tokens          # static Python int

    def issue_gather(chunk_idx, slot):
        off = base + chunk_idx * chunk_tokens

        @pl.loop(0, chunk_tokens)
        def _(t):
            row = ids_ref[off + t]
            pltpu.make_async_copy(
                emb_hbm.at[pl.ds(row, 1), :],
                rows_vmem.at[slot, pl.ds(t, 1), :],
                sem.at[slot],
            ).start()

    def wait_gather(slot):
        # Wait only needs the copy shape (identical (1, D) for every row copy)
        # to know the semaphore decrement -- no ids reads, no address math.
        @pl.loop(0, chunk_tokens)
        def _(_t):
            pltpu.make_async_copy(
                emb_hbm.at[pl.ds(0, 1), :],
                rows_vmem.at[slot, pl.ds(0, 1), :],
                sem.at[slot],
            ).wait()

    gamma = gamma_ref[...]                           # (1, D) f32
    beta = beta_ref[...]

    issue_gather(0, 0)                               # prime slot 0 for this tile
    for c in range(n_chunks):                        # static unroll (small)
        slot = c & 1
        wait_gather(slot)
        if c + 1 < n_chunks:                         # prefetch next chunk:
            issue_gather(c + 1, 1 - slot)            # overlaps with compute below

        x = rows_vmem[slot].astype(jnp.float32)      # (chunk, D) f32
        # Two-pass LayerNorm statistics (mean subtracted before squaring).
        mean = jnp.mean(x, axis=-1, keepdims=True)
        xc = x - mean
        var = jnp.mean(xc * xc, axis=-1, keepdims=True)
        inv = lax.rsqrt(var + eps)                   # EUP
        y = xc * inv * gamma + beta
        out_ref[pl.ds(c * chunk_tokens, chunk_tokens), :] = y.astype(out_ref.dtype)


def gene_encoder(ids, emb_table, gamma, beta, *, eps=1e-5,
                 block_tokens=512, chunk_tokens=128, out_dtype=None):
    """ids: (B, S) int -> (B, S, D).  Matches nn.Embedding + nn.LayerNorm."""
    b, s = ids.shape
    v, d = emb_table.shape
    n = b * s
    out_dtype = emb_table.dtype if out_dtype is None else out_dtype

    # Rows per DMA wave: multiple of 8 sublanes, no bigger than the token count.
    chunk = _round_up(min(max(chunk_tokens, 8), _round_up(n, 8)), 8)
    total_chunks = pl.cdiv(n, chunk)
    # Chunks per token tile: capped by block_tokens, but keep >= 2 grid steps
    # when there are enough tokens so both v7x TensorCores get work.
    max_cpt = max(block_tokens // chunk, 1)
    cpt = min(max_cpt, max(total_chunks // 2, 1)) if total_chunks >= 2 else 1
    tm = cpt * chunk
    n_pad = _round_up(n, tm)
    grid = (n_pad // tm,)

    # Flatten, clamp (the in-kernel DMA gather has no bounds check), pad.
    flat_ids = jnp.clip(ids.reshape(n).astype(jnp.int32), 0, v - 1)
    flat_ids = jnp.pad(flat_ids, (0, n_pad - n))

    gamma2 = gamma.reshape(1, d).astype(jnp.float32)
    beta2 = beta.reshape(1, d).astype(jnp.float32)

    kernel = functools.partial(_gene_encoder_kernel, block_tokens=tm,
                               chunk_tokens=chunk, eps=eps)

    emb_bytes = jnp.dtype(emb_table.dtype).itemsize
    out_bytes = jnp.dtype(out_dtype).itemsize
    vmem_need = (2 * tm * d * out_bytes            # double-buffered out tile
                 + 2 * chunk * d * emb_bytes       # double-buffered gather buf
                 + 4 * d * 4)                      # gamma / beta
    vmem_limit = int(min(max(2 * vmem_need, 16 * 1024 * 1024), 48 * 1024 * 1024))

    out2d = pl.pallas_call(
        kernel,
        out_shape=jax.ShapeDtypeStruct((n_pad, d), out_dtype),
        grid_spec=pltpu.PrefetchScalarGridSpec(
            num_scalar_prefetch=1,                          # flat_ids -> SMEM
            grid=grid,
            in_specs=[
                pl.BlockSpec(memory_space=pl.ANY),          # emb table (HBM, native dtype)
                pl.BlockSpec((1, d), lambda i, ids: (0, 0)),  # gamma (resident)
                pl.BlockSpec((1, d), lambda i, ids: (0, 0)),  # beta  (resident)
            ],
            out_specs=pl.BlockSpec((tm, d), lambda i, ids: (i, 0)),
            scratch_shapes=[
                pltpu.VMEM((2, chunk, d), emb_table.dtype),  # gathered rows, 2 slots
                pltpu.SemaphoreType.DMA((2,)),               # per-slot accumulating sem
            ],
        ),
        compiler_params=pltpu.CompilerParams(
            dimension_semantics=("parallel",),               # megacore on v7x
            vmem_limit_bytes=vmem_limit,
        ),
        cost_estimate=pl.CostEstimate(
            flops=9 * n_pad * d,
            transcendentals=n_pad,
            bytes_accessed=n_pad * d * (emb_bytes + out_bytes) + n_pad * 4,
        ),
    )(flat_ids, emb_table, gamma2, beta2)

    return out2d[:n].reshape(b, s, d)


def _reference(ids, emb_table, gamma, beta, eps=1e-5):
    g = emb_table[ids]                                      # (B, S, D)
    mean = jnp.mean(g, axis=-1, keepdims=True)
    var = jnp.mean((g - mean) ** 2, axis=-1, keepdims=True)
    return (g - mean) / jnp.sqrt(var + eps) * gamma + beta


if __name__ == "__main__":
    # Module config (synthetic, deterministic init -- no checkpoint loading).
    num_embeddings = 64
    embedding_dim = 32
    padding_idx = 0          # nn.Embedding(padding_idx=0): that row is zeroed
    batch, seq = 2, 16

    key = jax.random.PRNGKey(0)
    k_emb, k_ids = jax.random.split(key)

    # nn.Embedding default init: N(0, 1); zero the padding row.
    emb_table = jax.random.normal(k_emb, (num_embeddings, embedding_dim), jnp.float32)
    emb_table = emb_table.at[padding_idx].set(0.0)

    # nn.LayerNorm default init: weight=1, bias=0.
    gamma = jnp.ones((embedding_dim,), jnp.float32)
    beta = jnp.zeros((embedding_dim,), jnp.float32)

    ids = jax.random.randint(k_ids, (batch, seq), 0, num_embeddings, dtype=jnp.int32)

    ref = _reference(ids, emb_table, gamma, beta)

    # 1) Default tiling (one tile / one chunk at this toy size).
    out = jax.block_until_ready(gene_encoder(ids, emb_table, gamma, beta))
    assert out.shape == (batch, seq, embedding_dim)
    assert jnp.allclose(out, ref, atol=1e-5, rtol=1e-5)

    # 2) Small tiles: exercises multi-tile grid + double-buffered chunk gather.
    out2 = jax.block_until_ready(
        gene_encoder(ids, emb_table, gamma, beta, block_tokens=16, chunk_tokens=8))
    assert jnp.allclose(out2, ref, atol=1e-5, rtol=1e-5)

    # 3) Native bf16 table path (no whole-table f32 cast; f32 LN math, bf16 out).
    emb_bf16 = emb_table.astype(jnp.bfloat16)
    out3 = jax.block_until_ready(
        gene_encoder(ids, emb_bf16, gamma, beta, block_tokens=16, chunk_tokens=8))
    ref3 = _reference(ids, emb_bf16.astype(jnp.float32), gamma, beta)
    assert out3.dtype == jnp.bfloat16
    assert jnp.allclose(out3.astype(jnp.float32), ref3, atol=2e-2, rtol=2e-2)

    print("KERNEL_OK")
</pallas_src>

<mosaic_0001>
module attributes {stable_mosaic.version = 11 : i64} {
  func.func @_gene_encoder_kernel(%arg0: i32, %arg1: memref<32xi32, #tpu.memory_space<smem>>, %arg2: memref<64x32xf32, #tpu.memory_space<any>>, %arg3: memref<1x32xf32, #tpu.memory_space<vmem>>, %arg4: memref<1x32xf32, #tpu.memory_space<vmem>>, %arg5: memref<32x32xf32, #tpu.memory_space<vmem>>, %arg6: memref<2x32x32xf32, #tpu.memory_space<vmem>>, %arg7: memref<2x!tpu.dma_semaphore, #tpu.memory_space<semaphore_mem>>) attributes {dimension_semantics = [#tpu.dimension_semantics<parallel>], iteration_bounds = array<i64: 1>, scalar_prefetch = 1 : i64, scratch_operands = 2 : i64, tpu.core_type = #tpu.core_type<tc>, window_params = [{}, {pipeline_mode = #tpu.pipeline_mode<synchronous>, transform_indices = @transform_1, window_bounds = array<i64: 1, 32>}, {pipeline_mode = #tpu.pipeline_mode<synchronous>, transform_indices = @transform_2, window_bounds = array<i64: 1, 32>}, {transform_indices = @transform_3, window_bounds = array<i64: 32, 32>}]} {
    %c32_i32 = arith.constant 32 : i32
    %0 = arith.muli %arg0, %c32_i32 : i32
    %c0 = arith.constant 0 : index
    %c0_0 = arith.constant 0 : index
    %1 = vector.load %arg3[%c0, %c0_0] : memref<1x32xf32, #tpu.memory_space<vmem>>, vector<1x32xf32>
    %c0_1 = arith.constant 0 : index
    %c0_2 = arith.constant 0 : index
    %2 = vector.load %arg4[%c0_1, %c0_2] : memref<1x32xf32, #tpu.memory_space<vmem>>, vector<1x32xf32>
    %c0_i32 = arith.constant 0 : i32
    %3 = arith.addi %0, %c0_i32 : i32
    %c0_i32_3 = arith.constant 0 : i32
    %c32_i32_4 = arith.constant 32 : i32
    %4 = arith.addi %c0_i32_3, %c32_i32_4 : i32
    %c1_i32 = arith.constant 1 : i32
    scf.for %arg8 = %c0_i32_3 to %4 step %c1_i32  : i32 {
      %c1_i32_18 = arith.constant 1 : i32
      %29 = arith.muli %arg8, %c1_i32_18 : i32
      %c0_i32_19 = arith.constant 0 : i32
      %30 = arith.addi %c0_i32_19, %29 : i32
      %31 = arith.addi %3, %30 : i32
      %32 = arith.index_cast %31 : i32 to index
      %33 = memref.load %arg1[%32] : memref<32xi32, #tpu.memory_space<smem>>
      %c0_i32_20 = arith.constant 0 : i32
      %c0_i32_21 = arith.constant 0 : i32
      %c0_i32_22 = arith.constant 0 : i32
      %34 = tpu.memref_slice %arg2[%33, %c0_i32_22] : memref<64x32xf32, #tpu.memory_space<any>> -> memref<1x32xf32, #tpu.memory_space<any>>
      %c0_i32_23 = arith.constant 0 : i32
      %35 = tpu.memref_slice %arg6[%c0_i32_20, %30, %c0_i32_23] : memref<2x32x32xf32, #tpu.memory_space<vmem>> -> memref<1x1x32xf32, #tpu.memory_space<vmem>>
      %36 = tpu.memref_squeeze %35 : memref<1x1x32xf32, #tpu.memory_space<vmem>> -> memref<1x32xf32, #tpu.memory_space<vmem>>
      %37 = tpu.memref_slice %arg7[%c0_i32_21] : memref<2x!tpu.dma_semaphore, #tpu.memory_space<semaphore_mem>> -> memref<1x!tpu.dma_semaphore, #tpu.memory_space<semaphore_mem>>
      %38 = tpu.memref_squeeze %37 : memref<1x!tpu.dma_semaphore, #tpu.memory_space<semaphore_mem>> -> memref<!tpu.dma_semaphore, #tpu.memory_space<semaphore_mem>>
      tpu.enqueue_dma source(%34 : memref<1x32xf32, #tpu.memory_space<any>>) target(%36 : memref<1x32xf32, #tpu.memory_space<vmem>>) target_semaphore(%38 : memref<!tpu.dma_semaphore, #tpu.memory_space<semaphore_mem>>)
    }
    %c32_i32_5 = arith.constant 32 : i32
    %c0_i32_6 = arith.constant 0 : i32
    %c32_i32_7 = arith.constant 32 : i32
    %5 = arith.addi %c0_i32_6, %c32_i32_7 : i32
    %c1_i32_8 = arith.constant 1 : i32
    scf.for %arg8 = %c0_i32_6 to %5 step %c1_i32_8  : i32 {
      %c0_i32_18 = arith.constant 0 : i32
      %c0_i32_19 = arith.constant 0 : i32
      %c0_i32_20 = arith.constant 0 : i32
      %c0_i32_21 = arith.constant 0 : i32
      %29 = tpu.memref_slice %arg2[%c0_i32_20, %c0_i32_21] : memref<64x32xf32, #tpu.memory_space<any>> -> memref<1x32xf32, #tpu.memory_space<any>>
      %c0_i32_22 = arith.constant 0 : i32
      %c0_i32_23 = arith.constant 0 : i32
      %30 = tpu.memref_slice %arg6[%c0_i32_18, %c0_i32_22, %c0_i32_23] : memref<2x32x32xf32, #tpu.memory_space<vmem>> -> memref<1x1x32xf32, #tpu.memory_space<vmem>>
      %31 = tpu.memref_squeeze %30 : memref<1x1x32xf32, #tpu.memory_space<vmem>> -> memref<1x32xf32, #tpu.memory_space<vmem>>
      %32 = tpu.memref_slice %arg7[%c0_i32_19] : memref<2x!tpu.dma_semaphore, #tpu.memory_space<semaphore_mem>> -> memref<1x!tpu.dma_semaphore, #tpu.memory_space<semaphore_mem>>
      %33 = tpu.memref_squeeze %32 : memref<1x!tpu.dma_semaphore, #tpu.memory_space<semaphore_mem>> -> memref<!tpu.dma_semaphore, #tpu.memory_space<semaphore_mem>>
      tpu.wait_dma2 semaphore(%33 : memref<!tpu.dma_semaphore, #tpu.memory_space<semaphore_mem>>) src(%29 : memref<1x32xf32, #tpu.memory_space<any>>) dst(%31 : memref<1x32xf32, #tpu.memory_space<vmem>>)
    }
    %c0_9 = arith.constant 0 : index
    %c0_10 = arith.constant 0 : index
    %c0_11 = arith.constant 0 : index
    %6 = vector.load %arg6[%c0_9, %c0_10, %c0_11] : memref<2x32x32xf32, #tpu.memory_space<vmem>>, vector<1x32x32xf32>
    %7 = vector.shape_cast %6 : vector<1x32x32xf32> to vector<32x32xf32>
    %cst = arith.constant dense<0.000000e+00> : vector<32xf32>
    %8 = vector.multi_reduction <add>, %7, %cst [1] : vector<32x32xf32> to vector<32xf32>
    %9 = vector.shape_cast %8 : vector<32xf32> to vector<32x1xf32>
    %cst_12 = arith.constant 3.200000e+01 : f32
    %10 = vector.broadcast %cst_12 : f32 to vector<32x1xf32>
    %11 = arith.divf %9, %10 : vector<32x1xf32>
    %12 = vector.broadcast %11 : vector<32x1xf32> to vector<32x32xf32>
    %13 = arith.subf %7, %12 : vector<32x32xf32>
    %14 = arith.mulf %13, %13 : vector<32x32xf32>
    %cst_13 = arith.constant dense<0.000000e+00> : vector<32xf32>
    %15 = vector.multi_reduction <add>, %14, %cst_13 [1] : vector<32x32xf32> to vector<32xf32>
    %16 = vector.shape_cast %15 : vector<32xf32> to vector<32x1xf32>
    %cst_14 = arith.constant 3.200000e+01 : f32
    %17 = vector.broadcast %cst_14 : f32 to vector<32x1xf32>
    %18 = arith.divf %16, %17 : vector<32x1xf32>
    %cst_15 = arith.constant 9.99999974E-6 : f32
    %19 = vector.broadcast %cst_15 : f32 to vector<32x1xf32>
    %20 = arith.addf %18, %19 : vector<32x1xf32>
    %21 = math.rsqrt %20 : vector<32x1xf32>
    %22 = vector.broadcast %21 : vector<32x1xf32> to vector<32x32xf32>
    %23 = arith.mulf %13, %22 : vector<32x32xf32>
    %24 = vector.broadcast %1 : vector<1x32xf32> to vector<32x32xf32>
    %25 = arith.mulf %23, %24 : vector<32x32xf32>
    %26 = vector.broadcast %2 : vector<1x32xf32> to vector<32x32xf32>
    %27 = arith.addf %25, %26 : vector<32x32xf32>
    %c0_16 = arith.constant 0 : index
    %c0_17 = arith.constant 0 : index
    %28 = vector.load %arg5[%c0_16, %c0_17] : memref<32x32xf32, #tpu.memory_space<vmem>>, vector<32x32xf32>
    tpu.vector_store %arg5[%c0_16, %c0_17], %27 {strides = array<i32>} : memref<32x32xf32, #tpu.memory_space<vmem>>, vector<32x32xf32>,
    return
  }
  func.func @transform_1(%arg0: i32, %arg1: memref<32xi32, #tpu.memory_space<smem>>) -> (i32, i32) {
    %c0_i32 = arith.constant 0 : i32
    %c0_i32_0 = arith.constant 0 : i32
    %c0_i32_1 = arith.constant 0 : i32
    return %c0_i32, %c0_i32_0 : i32, i32
  }
  func.func @transform_2(%arg0: i32, %arg1: memref<32xi32, #tpu.memory_space<smem>>) -> (i32, i32) {
    %c0_i32 = arith.constant 0 : i32
    %c0_i32_0 = arith.constant 0 : i32
    %c0_i32_1 = arith.constant 0 : i32
    return %c0_i32, %c0_i32_0 : i32, i32
  }
  func.func @transform_3(%arg0: i32, %arg1: memref<32xi32, #tpu.memory_space<smem>>) -> (i32, i32) {
    %c0_i32 = arith.constant 0 : i32
    %c0_i32_0 = arith.constant 0 : i32
    return %arg0, %c0_i32 : i32, i32
  }
}

</mosaic_0001>

<bundles_post_ra>
// kernel: tpu_custom_call.1
= control target key start
LH: loop header
LB: loop body
LE: loop exit
PB: predicated region body
PF: predicated region fallthrough
CT: control target
= control target key end

     0   :  { %s384_s0 = inlined_call_operand.vmem [shape: s32[32], index: 0, kind: input, shape index: {}]   ;;  %s385_s1 = inlined_call_operand.vmem [shape: f32[64,32], index: 1, kind: input, shape index: {}]   ;;  %s386_s2 = inlined_call_operand.vmem [shape: f32[1,32], index: 2, kind: input, shape index: {}]   ;;  %s387_s3 = inlined_call_operand.vmem [shape: f32[1,32], index: 3, kind: input, shape index: {}]   ;;  %s388_s4 = inlined_call_operand.hbm [shape: f32[32,32], index: 4, kind: output, shape index: {}]  }
   0x1   :  { %s9_s17 = sshll.u32 %s384_s0, 4  ;;  %s10_s17 = int_to_ptr.vmem [resolvable:$true] %s9_s17 }
   0x2   :  { %s251_s18 = scalar_lea.vmem %s10_s17, 16  ;;  %p256_p1 = scmp.lt.s32.totalorder %s10_s17, %s10_s17 }
   0x3   :  { %p252_p0 = scmp.ne.s32.totalorder %s10_s17, %s251_s18  ;;  %p257_p2 = scmp.lt.s32.totalorder %s251_s18, %s251_s18 }
   0x5   :  { %p258_p3 = por %p257_p2, %p256_p1 }
   0x7   :  { %p259_p4 = pnand %p258_p3, %p252_p0 }
   0x9   :  { %262 = shalt.err (!%p259_p4)  }
   0xa   :  { %s307_s19 = smov [#allocation5]  }
   0xb   :  { %12 = dma.vmem_to_smem %s10_s17, 16, %s307_s19, [#allocation4] }
   0xc   :  { %293 = dma.done.wait [#allocation4], 16 }
   0xd   :  { %294 = vsyncadd [#allocation4], 4294967280 }
   0xe   :  { %14 = sfence }
   0xf   :  { %15 = vsyncpa [#allocation7], 0  ;;  %v342_v0 = vld [vmem:[%s386_s2] ss:$0 sm:$0xff]  ;;  %s299_s23 = smov 0  }
  0x10   :  { %v347_v1 = vld [vmem:[%s387_s3] ss:$0 sm:$0xff] }
  0x11 LB: > { %s30_s24 = sld [smem:[#allocation5 + %s301_s23]]  ;;  %s32_s28 = scalar_lea.vmem [#allocation2], %s301_s23  ;;  %s301_s23 = sphi %s299_s23, %s28_s23  }
  0x17   : > { %s31_s27 = scalar_lea.vmem %s385_s1, %s30_s24 }
  0x18   : > { %v50_v2 = vld [vmem:[%s31_s27] sm:$0x1] }
  0x19   : > { %51 = vst [vmem:[%s32_s28] sm:$0x1] %v50_v2 }
  0x1a   : > { %76 = vsyncadd [#allocation3], 16  ;;  %s28_s23 = sadd.s32 1, %s301_s23  }
  0x1b   : > { %p25_p5 = scmp.ge.s32.totalorder %s28_s23, 32  }
  0x1c   :  { %s303_s2 = smov (%p25_p5), 0  }
  0x1d   :  { %27 = sbr.rel (!%p25_p5) target bundleno = 17 (0x11), region = 85 }
  0x24 LB: > { %295 = dma.done.wait [#allocation3], 16  ;;  %s305_s2 = sphi %s303_s2, %s82_s2  }
  0x25   : > { %296 = vsyncadd [#allocation3], 4294967280  ;;  %s82_s2 = sadd.s32 1, %s305_s2  }
  0x26   : > { %p79_p6 = scmp.ge.s32.totalorder %s82_s2, 32  }
  0x27   :  { %v86_v3 = vld [vmem:[#allocation2] sm:$0xff] (%p79_p6)  ;;  %vm90_vm0 = vcmask (%p79_p6), 261120   ;;  %v88_v4 = vld [vmem:[#allocation2 + $0x10] sm:$0xff] (%p79_p6)  ;;  %v87_v5 = vld [vmem:[#allocation2 + $0x8] sm:$0xff] (%p79_p6)  ;;  %s308_s1 = smov (%p79_p6), [#allocation6]  }
  0x28   :  { %81 = sbr.rel (!%p79_p6) target bundleno = 36 (0x24), region = 96  ;;  %v91_v6 = vsel (%p79_p6), %vm90_vm0, %v86_v3, 0.0  ;;  %v97_v7 = vsel (%p79_p6), %vm90_vm0, %v88_v4, 0.0  ;;  %v89_v8 = vld [vmem:[#allocation2 + $0x18] sm:$0xff] (%p79_p6)  ;;  %v94_v9 = vsel (%p79_p6), %vm90_vm0, %v87_v5, 0.0  ;;  %s173_s3 = sshll.u32 (%p79_p6), %s308_s1, 4  ;;  %s174_s3 = int_to_ptr.vmem [resolvable:$true] %s173_s3 }
  0x29   :  { %92 = vadd.xlane.f32.xlu0 (%p79_p6), %v91_v6  ;;  %98 = vadd.xlane.f32.xlu1 (%p79_p6), %v97_v7  ;;  %v100_v10 = vsel (%p79_p6), %vm90_vm0, %v89_v8, 0.0  ;;  %s263_s29 = scalar_lea.vmem (%p79_p6), %s174_s3, 512  ;;  %p268_p8 = scmp.lt.s32.totalorder (%p79_p6), %s174_s3, %s174_s3 }
  0x2a   :  { %p264_p7 = scmp.ne.s32.totalorder (%p79_p6), %s174_s3, %s263_s29  ;;  %p269_p9 = scmp.lt.s32.totalorder (%p79_p6), %s263_s29, %s263_s29 }
  0x2c   :  { %p270_p10 = por (%p79_p6), %p269_p9, %p268_p8 }
  0x2d   :  { %95 = vadd.xlane.f32.xlu0 (%p79_p6), %v94_v9  ;;  %101 = vadd.xlane.f32.xlu1 (%p79_p6), %v100_v10 }
  0x2e   :  { %p271_p11 = pnand (%p79_p6), %p270_p10, %p264_p7 }
  0xb6   :  { %v93_v11 = vpop.xlane.xlu0 %92  ;;  %v99_v12 = vpop.xlane.xlu1 %98 }
  0xb7   :  { %v104_v13 = vmul.f32 0.03125, %v93_v11  ;;  %v106_v14 = vmul.f32 0.03125, %v99_v12 }
  0xb9   :  { %v108_v15 = vsub.f32 %v86_v3, %v104_v13  ;;  %v110_v16 = vsub.f32 %v88_v4, %v106_v14 }
  0xba   :  { %v96_v17 = vpop.xlane.xlu0 %95  ;;  %v102_v18 = vpop.xlane.xlu1 %101 }
  0xbb   :  { %v105_v19 = vmul.f32 0.03125, %v96_v17  ;;  %v107_v20 = vmul.f32 0.03125, %v102_v18  ;;  %v112_v21 = vmul.f32 %v108_v15, %v108_v15  ;;  %v114_v22 = vmul.f32 %v110_v16, %v110_v16 }
  0xbd   :  { %v109_v23 = vsub.f32 %v87_v5, %v105_v19  ;;  %v111_v24 = vsub.f32 %v89_v8, %v107_v20  ;;  %v116_v25 = vsel %vm90_vm0, %v112_v21, 0.0  ;;  %v122_v26 = vsel %vm90_vm0, %v114_v22, 0.0 }
  0xbe   :  { %117 = vadd.xlane.f32.xlu0 %v116_v25 }
  0xbf   :  { %v113_v27 = vmul.f32 %v109_v23, %v109_v23  ;;  %v115_v28 = vmul.f32 %v111_v24, %v111_v24 }
  0xc1   :  { %v119_v29 = vsel %vm90_vm0, %v113_v27, 0.0  ;;  %v125_v30 = vsel %vm90_vm0, %v115_v28, 0.0 }
  0xc2   :  { %123 = vadd.xlane.f32.xlu0 %v122_v26  ;;  %120 = vadd.xlane.f32.xlu1 %v119_v29 }
  0xc6   :  { %126 = vadd.xlane.f32.xlu1 %v125_v30 }
 0x14b   :  { %v118_v31 = vpop.xlane.xlu0 %117 }
 0x14c   :  { %v128_v32 = vmul.f32 0.03125, %v118_v31 }
 0x14e   :  { %v132_v33 = vadd.f32 1e-05, %v128_v32 }
 0x14f   :  { %v121_v34 = vpop.xlane.xlu1 %120  ;;  %v124_v35 = vpop.xlane.xlu0 %123 }
 0x150   :  { %243 = vrsqrt.f32 %v132_v33  ;;  %v129_v36 = vmul.f32 0.03125, %v121_v34  ;;  %v130_v37 = vmul.f32 0.03125, %v124_v35 }
 0x152   :  { %v133_v38 = vadd.f32 1e-05, %v129_v36  ;;  %v134_v39 = vadd.f32 1e-05, %v130_v37 }
 0x153   :  { %v127_v40 = vpop.xlane.xlu1 %126 }
 0x154   :  { %245 = vrsqrt.f32 %v133_v38  ;;  %v131_v41 = vmul.f32 0.03125, %v127_v40 }
 0x155   :  { %247 = vrsqrt.f32 %v134_v39 }
 0x156   :  { %v135_v42 = vadd.f32 1e-05, %v131_v41 }
 0x158   :  { %249 = vrsqrt.f32 %v135_v42 }
 0x15a   :  { %v244_v43 = vpop.eup %243 }
 0x15b   :  { %v140_v44 = vmul.f32 %v244_v43, %v108_v15 }
 0x15d   :  { %v150_v45 = vmul.f32 %v342_v0, %v140_v44 }
 0x15e   :  { %v246_v46 = vpop.eup %245 }
 0x15f   :  { %v248_v47 = vpop.eup %247  ;;  %v160_v48 = vadd.f32 %v347_v1, %v150_v45  ;;  %v141_v49 = vmul.f32 %v246_v46, %v109_v23 }
 0x160   :  { %v142_v50 = vmul.f32 %v248_v47, %v110_v16 }
 0x161   :  { %164 = vst.msk [vmem:[#allocation6] sm:$0xff] %vm90_vm0, %v160_v48  ;;  %v151_v51 = vmul.f32 %v342_v0, %v141_v49 }
 0x162   :  { %v250_v52 = vpop.eup %249  ;;  %v152_v53 = vmul.f32 %v342_v0, %v142_v50 }
 0x163   :  { %v161_v54 = vadd.f32 %v347_v1, %v151_v51  ;;  %v143_v55 = vmul.f32 %v250_v52, %v111_v24 }
 0x164   :  { %v162_v56 = vadd.f32 %v347_v1, %v152_v53 }
 0x165   :  { %165 = vst.msk [vmem:[#allocation6 + $0x8] sm:$0xff] %vm90_vm0, %v161_v54  ;;  %v153_v57 = vmul.f32 %v342_v0, %v143_v55 }
 0x166   :  { %166 = vst.msk [vmem:[#allocation6 + $0x10] sm:$0xff] %vm90_vm0, %v162_v56 }
 0x167   :  { %v163_v58 = vadd.f32 %v347_v1, %v153_v57 }
 0x169   :  { %167 = vst.msk [vmem:[#allocation6 + $0x18] sm:$0xff] %vm90_vm0, %v163_v58 }
 0x16a   :  { %274 = shalt.err (!%p271_p11)
}
 0x16b   :  { %s275_s6 = scalar_lea.hbm %s388_s4, 512 }
 0x16c   :  { %p276_p12 = scmp.ne.s32.totalorder %s388_s4, %s275_s6  ;;  %p279_p13 = scmp.lt.u32.totalorder %s275_s6, %s388_s4 }
 0x16e   :  { %p281_p0 = pnand %p279_p13, %p276_p12 }
 0x170   :  { %284 = shalt.err (!%p281_p0)
}
 0x171   :  { %s309_s11 = smov 128   ;;  %s310_s12 = smov 8  }
 0x172   :  { %179 = dma.vmem_to_hbm [thread:$0]  %s174_s3, 512, %s388_s4, [#allocation7], %s309_s11, %s309_s11, %s310_s12  }
 0x173   :  { %297 = dma.done.wait [#allocation7], 512  }
 0x174   :  { %298 = vsyncadd [#allocation7], 4294966784 }
 0x175   :  { %183 = vsyncpa [#allocation7], 1 }
 0x176   :  { %184 = vsyncmov [#allocation3] }
 0x179   :  { %s185_s15 = vpop.sfrf %184 }
 0x17a   :  { %p221_p1 = scmp.ne.s32.totalorder %s185_s15, 0 }
 0x17c   :  { %189 = shalt.err (%p221_p1)  }
 0x17d   :  { %191 = vsyncmov [#allocation3 + $0x1] }
 0x180   :  { %s192_s16 = vpop.sfrf %191 }
 0x181   :  { %p222_p2 = scmp.ne.s32.totalorder %s192_s16, 0 }
 0x183   :  { %196 = shalt.err (%p222_p2)  }

</bundles_post_ra>
